<compile_context>
chip_gen: v5e
topology: v5e:2x2
jax: 0.10.0
libtpu: 0.0.40
codegen_flags: <defaults>
</compile_context>

<pallas_src>
import functools

import jax
import jax.numpy as jnp
from jax.experimental import pallas as pl
from jax.experimental.pallas import tpu as pltpu

IGNORE_INDEX = 255
MAX_TILE_P = 2048                         # pixels (lanes) per grid step; multiple of 128
_LOGITS_BLOCK_BUDGET = 8 * 1024 * 1024    # bytes for one double-buffered logits block


def _ce_kernel(x_ref, t_ref, sum_ref, cnt_ref, *, ignore_index, hw, tile_p):
    """Masked per-pixel cross-entropy for one (batch, pixel-tile) grid step.

    x_ref:   (C, TILE_P) logits (native dtype, upcast here).
    t_ref:   (1, TILE_P) int32 targets.
    sum_ref: (1, TILE_P) f32 per-lane loss partial sums (resident across pixel tiles).
    cnt_ref: (1, TILE_P) f32 per-lane valid-pixel counts.
    """
    j = pl.program_id(1)

    @pl.when(j == 0)
    def _():
        sum_ref[...] = jnp.zeros_like(sum_ref)
        cnt_ref[...] = jnp.zeros_like(cnt_ref)

    x = x_ref[...].astype(jnp.float32)                                 # (C, TP)
    t = t_ref[...]                                                     # (1, TP)

    # Numerically stable per-pixel logsumexp over the class (sublane) axis.
    m = jnp.max(x, axis=0, keepdims=True)                              # (1, TP)
    lse = m + jnp.log(jnp.sum(jnp.exp(x - m), axis=0, keepdims=True))  # (1, TP)

    # Gather the logit at the target class via class-index iota + select-sum.
    cls = jax.lax.broadcasted_iota(jnp.int32, x.shape, 0)              # (C, TP)
    sel = jnp.sum(jnp.where(cls == t, x, 0.0), axis=0, keepdims=True)  # (1, TP)

    # Lane mask: drop ignored pixels and out-of-range lanes of the tail tile.
    pos = j * tile_p + jax.lax.broadcasted_iota(jnp.int32, t.shape, 1)
    valid = (t != ignore_index) & (pos < hw)

    # Lane-wise accumulation (VPU only; no cross-lane reduce in the hot loop).
    sum_ref[...] += jnp.where(valid, lse - sel, 0.0)
    cnt_ref[...] += valid.astype(jnp.float32)


def semantic_loss(logits_nchw, targets_nhw, ignore_index=IGNORE_INDEX):
    """Mean cross-entropy over non-ignored pixels (matches nn.CrossEntropyLoss)."""
    n, c, h, w = logits_nchw.shape
    hw = h * w

    # The class-iota gather assumes ignore_index is never a valid class id.
    assert not (0 <= ignore_index < c), "ignore_index must lie outside [0, C)"

    # Free views (no transpose / pad / HBM copies in the wrapper).
    x = logits_nchw.reshape(n, c, hw)
    t = targets_nhw.reshape(n, 1, hw).astype(jnp.int32)

    # Pick the largest lane tile that keeps the double-buffered logits block within a
    # conservative VMEM budget (portable to v7x's 64 MiB VMEM / 32 MiB scoped default).
    itemsize = jnp.dtype(logits_nchw.dtype).itemsize
    cap = max(128, (_LOGITS_BLOCK_BUDGET // (c * itemsize * 2)) // 128 * 128)
    tile_p = min(MAX_TILE_P, cap, max(128, (hw // 128) * 128))
    num_tiles = pl.cdiv(hw, tile_p)

    kernel = functools.partial(
        _ce_kernel, ignore_index=ignore_index, hw=hw, tile_p=tile_p)

    cost = pl.CostEstimate(
        flops=6 * n * c * hw,
        transcendentals=n * (c + 1) * hw,
        bytes_accessed=int(x.size) * itemsize + int(t.size) * 4
        + 2 * n * tile_p * 4,
    )

    sum_out, cnt_out = pl.pallas_call(
        kernel,
        out_shape=(
            jax.ShapeDtypeStruct((n, 1, tile_p), jnp.float32),
            jax.ShapeDtypeStruct((n, 1, tile_p), jnp.float32),
        ),
        grid_spec=pltpu.PrefetchScalarGridSpec(
            num_scalar_prefetch=0,
            grid=(n, num_tiles),
            in_specs=[
                pl.BlockSpec((None, c, tile_p), lambda b, j: (b, 0, j)),
                pl.BlockSpec((None, 1, tile_p), lambda b, j: (b, 0, j)),
            ],
            out_specs=[
                pl.BlockSpec((None, 1, tile_p), lambda b, j: (b, 0, 0)),
                pl.BlockSpec((None, 1, tile_p), lambda b, j: (b, 0, 0)),
            ],
        ),
        compiler_params=pltpu.CompilerParams(
            dimension_semantics=("parallel", "arbitrary")),
        cost_estimate=cost,
    )(x, t)

    # Tiny final reduction of the per-batch, per-lane partials (done by XLA).
    s = jnp.sum(sum_out)
    n_valid = jnp.sum(cnt_out)
    return jnp.where(n_valid > 0, s / n_valid, jnp.float32(0.0))


def _reference_loss(logits_nchw, targets_nhw, ignore_index=IGNORE_INDEX):
    n, c, h, w = logits_nchw.shape
    x = jnp.transpose(logits_nchw, (0, 2, 3, 1)).reshape(-1, c).astype(jnp.float32)
    t = targets_nhw.reshape(-1).astype(jnp.int32)
    logp = jax.nn.log_softmax(x, axis=-1)
    valid = t != ignore_index
    t_safe = jnp.where(valid, t, 0)
    nll = -jnp.take_along_axis(logp, t_safe[:, None], axis=-1)[:, 0]
    nll = jnp.where(valid, nll, 0.0)
    denom = jnp.sum(valid.astype(jnp.float32))
    return jnp.where(denom > 0, jnp.sum(nll) / denom, 0.0)


if __name__ == "__main__":
    key = jax.random.PRNGKey(0)

    def run_case(case_key, n, c, h, w):
        k1, k2, k3 = jax.random.split(case_key, 3)
        logits = jax.random.normal(k1, (n, c, h, w), dtype=jnp.float32)
        targets = jax.random.randint(k2, (n, h, w), 0, c, dtype=jnp.int32)
        ignore_mask = jax.random.bernoulli(k3, 0.1, (n, h, w))
        targets = jnp.where(ignore_mask, IGNORE_INDEX, targets)
        loss = jax.block_until_ready(semantic_loss(logits, targets))
        ref = _reference_loss(logits, targets)
        assert jnp.allclose(loss, ref, atol=1e-5, rtol=1e-5), (loss, ref)

    k1, k2 = jax.random.split(key)
    run_case(k1, 2, 4, 16, 16)   # H*W a multiple of 128 (no tail)
    run_case(k2, 2, 4, 12, 13)   # ragged H*W: exercises the tail-tile lane mask

    print("KERNEL_OK")
</pallas_src>

<mosaic_0001>
module attributes {stable_mosaic.version = 11 : i64} {
  func.func @_ce_kernel(%arg0: i32, %arg1: i32, %arg2: memref<1x4x256xf32, #tpu.memory_space<vmem>>, %arg3: memref<1x1x256xi32, #tpu.memory_space<vmem>>, %arg4: memref<1x1x256xf32, #tpu.memory_space<vmem>>, %arg5: memref<1x1x256xf32, #tpu.memory_space<vmem>>) attributes {dimension_semantics = [#tpu.dimension_semantics<parallel>, #tpu.dimension_semantics<arbitrary>], iteration_bounds = array<i64: 2, 1>, scalar_prefetch = 0 : i64, scratch_operands = 0 : i64, tpu.core_type = #tpu.core_type<tc>, window_params = [{transform_indices = @transform_0, window_bounds = array<i64: 1, 4, 256>}, {transform_indices = @transform_1, window_bounds = array<i64: 1, 1, 256>}, {transform_indices = @transform_2, window_bounds = array<i64: 1, 1, 256>}, {transform_indices = @transform_3, window_bounds = array<i64: 1, 1, 256>}]} {
    %c0_i32 = arith.constant 0 : i32
    %0 = arith.cmpi eq, %arg1, %c0_i32 : i32
    %1 = arith.extui %0 : i1 to i32
    %c0_i32_0 = arith.constant 0 : i32
    %2 = arith.cmpi ne, %1, %c0_i32_0 : i32
    scf.if %2 {
      %cst_23 = arith.constant 0.000000e+00 : f32
      %49 = vector.broadcast %cst_23 : f32 to vector<1x256xf32>
      %c0_24 = arith.constant 0 : index
      %c0_25 = arith.constant 0 : index
      %c0_26 = arith.constant 0 : index
      %50 = vector.load %arg4[%c0_24, %c0_25, %c0_26] : memref<1x1x256xf32, #tpu.memory_space<vmem>>, vector<1x1x256xf32>
      %51 = vector.shape_cast %50 : vector<1x1x256xf32> to vector<1x256xf32>
      %52 = vector.shape_cast %49 : vector<1x256xf32> to vector<1x1x256xf32>
      tpu.vector_store %arg4[%c0_24, %c0_25, %c0_26], %52 {strides = array<i32>} : memref<1x1x256xf32, #tpu.memory_space<vmem>>, vector<1x1x256xf32>,
      %cst_27 = arith.constant 0.000000e+00 : f32
      %53 = vector.broadcast %cst_27 : f32 to vector<1x256xf32>
      %c0_28 = arith.constant 0 : index
      %c0_29 = arith.constant 0 : index
      %c0_30 = arith.constant 0 : index
      %54 = vector.load %arg5[%c0_28, %c0_29, %c0_30] : memref<1x1x256xf32, #tpu.memory_space<vmem>>, vector<1x1x256xf32>
      %55 = vector.shape_cast %54 : vector<1x1x256xf32> to vector<1x256xf32>
      %56 = vector.shape_cast %53 : vector<1x256xf32> to vector<1x1x256xf32>
      tpu.vector_store %arg5[%c0_28, %c0_29, %c0_30], %56 {strides = array<i32>} : memref<1x1x256xf32, #tpu.memory_space<vmem>>, vector<1x1x256xf32>,
    } else {
    }
    %c0 = arith.constant 0 : index
    %c0_1 = arith.constant 0 : index
    %c0_2 = arith.constant 0 : index
    %3 = vector.load %arg2[%c0, %c0_1, %c0_2] : memref<1x4x256xf32, #tpu.memory_space<vmem>>, vector<1x4x256xf32>
    %4 = vector.shape_cast %3 : vector<1x4x256xf32> to vector<4x256xf32>
    %c0_3 = arith.constant 0 : index
    %c0_4 = arith.constant 0 : index
    %c0_5 = arith.constant 0 : index
    %5 = vector.load %arg3[%c0_3, %c0_4, %c0_5] : memref<1x1x256xi32, #tpu.memory_space<vmem>>, vector<1x1x256xi32>
    %6 = vector.shape_cast %5 : vector<1x1x256xi32> to vector<1x256xi32>
    %cst = arith.constant dense<0xFF800000> : vector<256xf32>
    %7 = vector.multi_reduction <maximumf>, %4, %cst [0] : vector<4x256xf32> to vector<256xf32>
    %8 = vector.shape_cast %7 : vector<256xf32> to vector<1x256xf32>
    %9 = vector.broadcast %8 : vector<1x256xf32> to vector<4x256xf32>
    %10 = arith.subf %4, %9 : vector<4x256xf32>
    %11 = math.exp %10 : vector<4x256xf32>
    %cst_6 = arith.constant dense<0.000000e+00> : vector<256xf32>
    %12 = vector.multi_reduction <add>, %11, %cst_6 [0] : vector<4x256xf32> to vector<256xf32>
    %13 = vector.shape_cast %12 : vector<256xf32> to vector<1x256xf32>
    %14 = math.log %13 : vector<1x256xf32>
    %15 = arith.addf %8, %14 : vector<1x256xf32>
    %16 = tpu.iota {dimensions = array<i32: 0>} : vector<4x256xi32>
    %17 = vector.broadcast %6 : vector<1x256xi32> to vector<4x256xi32>
    %18 = arith.cmpi eq, %16, %17 : vector<4x256xi32>
    %cst_7 = arith.constant 0.000000e+00 : f32
    %19 = vector.broadcast %cst_7 : f32 to vector<4x256xf32>
    %20 = arith.select %18, %4, %19 : vector<4x256xi1>, vector<4x256xf32>
    %cst_8 = arith.constant dense<0.000000e+00> : vector<256xf32>
    %21 = vector.multi_reduction <add>, %20, %cst_8 [0] : vector<4x256xf32> to vector<256xf32>
    %22 = vector.shape_cast %21 : vector<256xf32> to vector<1x256xf32>
    %c256_i32 = arith.constant 256 : i32
    %23 = arith.muli %arg1, %c256_i32 : i32
    %24 = tpu.iota {dimensions = array<i32: 1>} : vector<1x256xi32>
    %25 = vector.broadcast %23 : i32 to vector<1x256xi32>
    %26 = arith.addi %25, %24 : vector<1x256xi32>
    %c255_i32 = arith.constant 255 : i32
    %27 = vector.broadcast %c255_i32 : i32 to vector<1x256xi32>
    %28 = arith.cmpi ne, %6, %27 : vector<1x256xi32>
    %c256_i32_9 = arith.constant 256 : i32
    %29 = vector.broadcast %c256_i32_9 : i32 to vector<1x256xi32>
    %30 = arith.cmpi slt, %26, %29 : vector<1x256xi32>
    %31 = arith.andi %28, %30 : vector<1x256xi1>
    %c0_10 = arith.constant 0 : index
    %c0_11 = arith.constant 0 : index
    %c0_12 = arith.constant 0 : index
    %32 = vector.load %arg4[%c0_10, %c0_11, %c0_12] : memref<1x1x256xf32, #tpu.memory_space<vmem>>, vector<1x1x256xf32>
    %33 = vector.shape_cast %32 : vector<1x1x256xf32> to vector<1x256xf32>
    %34 = arith.subf %15, %22 : vector<1x256xf32>
    %cst_13 = arith.constant 0.000000e+00 : f32
    %35 = vector.broadcast %cst_13 : f32 to vector<1x256xf32>
    %36 = arith.select %31, %34, %35 : vector<1x256xi1>, vector<1x256xf32>
    %37 = arith.addf %33, %36 : vector<1x256xf32>
    %c0_14 = arith.constant 0 : index
    %c0_15 = arith.constant 0 : index
    %c0_16 = arith.constant 0 : index
    %38 = vector.load %arg4[%c0_14, %c0_15, %c0_16] : memref<1x1x256xf32, #tpu.memory_space<vmem>>, vector<1x1x256xf32>
    %39 = vector.shape_cast %38 : vector<1x1x256xf32> to vector<1x256xf32>
    %40 = vector.shape_cast %37 : vector<1x256xf32> to vector<1x1x256xf32>
    tpu.vector_store %arg4[%c0_14, %c0_15, %c0_16], %40 {strides = array<i32>} : memref<1x1x256xf32, #tpu.memory_space<vmem>>, vector<1x1x256xf32>,
    %c0_17 = arith.constant 0 : index
    %c0_18 = arith.constant 0 : index
    %c0_19 = arith.constant 0 : index
    %41 = vector.load %arg5[%c0_17, %c0_18, %c0_19] : memref<1x1x256xf32, #tpu.memory_space<vmem>>, vector<1x1x256xf32>
    %42 = vector.shape_cast %41 : vector<1x1x256xf32> to vector<1x256xf32>
    %43 = arith.extui %31 : vector<1x256xi1> to vector<1x256xi32>
    %44 = arith.sitofp %43 : vector<1x256xi32> to vector<1x256xf32>
    %45 = arith.addf %42, %44 : vector<1x256xf32>
    %c0_20 = arith.constant 0 : index
    %c0_21 = arith.constant 0 : index
    %c0_22 = arith.constant 0 : index
    %46 = vector.load %arg5[%c0_20, %c0_21, %c0_22] : memref<1x1x256xf32, #tpu.memory_space<vmem>>, vector<1x1x256xf32>
    %47 = vector.shape_cast %46 : vector<1x1x256xf32> to vector<1x256xf32>
    %48 = vector.shape_cast %45 : vector<1x256xf32> to vector<1x1x256xf32>
    tpu.vector_store %arg5[%c0_20, %c0_21, %c0_22], %48 {strides = array<i32>} : memref<1x1x256xf32, #tpu.memory_space<vmem>>, vector<1x1x256xf32>,
    return
  }
  func.func @transform_0(%arg0: i32, %arg1: i32) -> (i32, i32, i32) {
    %c0_i32 = arith.constant 0 : i32
    %c0_i32_0 = arith.constant 0 : i32
    return %arg0, %c0_i32, %arg1 : i32, i32, i32
  }
  func.func @transform_1(%arg0: i32, %arg1: i32) -> (i32, i32, i32) {
    %c0_i32 = arith.constant 0 : i32
    %c0_i32_0 = arith.constant 0 : i32
    return %arg0, %c0_i32, %arg1 : i32, i32, i32
  }
  func.func @transform_2(%arg0: i32, %arg1: i32) -> (i32, i32, i32) {
    %c0_i32 = arith.constant 0 : i32
    %c0_i32_0 = arith.constant 0 : i32
    %c0_i32_1 = arith.constant 0 : i32
    return %arg0, %c0_i32, %c0_i32_0 : i32, i32, i32
  }
  func.func @transform_3(%arg0: i32, %arg1: i32) -> (i32, i32, i32) {
    %c0_i32 = arith.constant 0 : i32
    %c0_i32_0 = arith.constant 0 : i32
    %c0_i32_1 = arith.constant 0 : i32
    return %arg0, %c0_i32, %c0_i32_0 : i32, i32, i32
  }
}

</mosaic_0001>

<bundles_post_ra>
// kernel: tpu_custom_call.1
= control target key start
LH: loop header
LB: loop body
LE: loop exit
PB: predicated region body
PF: predicated region fallthrough
CT: control target
= control target key end

     0   :  { %9 = vsyncpa [#allocation3], 0  ;;  %s1082_s0 = inlined_call_operand.hbm [shape: f32[2,4,256], index: 0, kind: input, shape index: {}]   ;;  %s1083_s1 = inlined_call_operand.hbm [shape: s32[2,1,256], index: 1, kind: input, shape index: {}]   ;;  %s1084_s2 = inlined_call_operand.hbm [shape: f32[2,1,256], index: 2, kind: output, shape index: {0}]   ;;  %s1085_s3 = inlined_call_operand.hbm [shape: f32[2,1,256], index: 3, kind: output, shape index: {1}]  }
   0x1   :  { %11 = vsyncpa [#allocation3 + $0x1], 0 }
   0x2   :  { %12 = vsyncpa [#allocation6], 0 }
   0x3   :  { %14 = vsyncpa [#allocation6 + $0x1], 0 }
   0x4   :  { %15 = vsyncpa [#allocation4], 0 }
   0x5   :  { %17 = vsyncpa [#allocation4 + $0x1], 0 }
   0x6   :  { %18 = vsyncpa [#allocation9], 0 }
   0x7   :  { %20 = vsyncpa [#allocation9 + $0x1], 0  ;;  %s870_s12 = smov 0   ;;  %s872_s13 = smov 0  }
   0x8   :  { %s874_s14 = smov 0   ;;  %s876_s15 = smov 0  }
   0x9   :  { %s878_s16 = smov 0   ;;  %s880_s17 = smov 0  }
   0xa LB: > { %s566_s18 = sadd.s32 4294967295, %s846_s17   ;;  %s567_s19 = sadd.s32 4294967294, %s846_s17   ;;  %s846_s17 = sphi %s880_s17, %s26_s17   ;;  %s842_s16 = sphi %s878_s16, %s1099_s16   ;;  %s838_s15 = sphi %s876_s15, %s1098_s15   ;;  %s834_s14 = sphi %s874_s14, %s1097_s14   ;;  %s830_s13 = sphi %s872_s13, %s1096_s13   ;;  %s826_s12 = sphi %s870_s12, %s1095_s12  }
   0xb   : > { %s38_s20 = sadd.s32 1, %s842_s16  ;;  %s47_s21 = sadd.s32 1, %s834_s14 }
   0xc   : > { %p40_p0 = scmp.ge.s32.totalorder %s38_s20, 2  ;;  %p54_p1 = scmp.ne.s32.totalorder %s834_s14, %s830_s13 }
   0xd   : > { %p55_p2 = scmp.eq.s32.totalorder %s846_s17, 0  ;;  %p60_p3 = scmp.ne.s32.totalorder %s830_s13, %s826_s12 }
   0xe   : > { %s1101_s20 = smov (%p40_p0, %s38_s20), 0  ;;  %p61_p5 = scmp.eq.s32.totalorder %s566_s18, 0 }
   0xf   : > { %p911_p4 = por %p55_p2, %p54_p1  ;;  %s42_s23 = ssub.s32 %s842_s16, %s1101_s20 }
  0x10   : > { %p112_p6 = scmp.eq.s32.totalorder %s566_s18, 1  ;;  %p45_p7 = scmp.eq.s32.totalorder %s42_s23, 0 }
  0x11   : > { %p917_p8 = por %p61_p5, %p60_p3  ;;  %p118_p10 = scmp.eq.s32.totalorder %s567_s19, 1 }
  0x12   : > { %p921_p9 = por %p112_p6, %p54_p1  ;;  %p569_p12 = scmp.ge.s32.totalorder %s846_s17, 2 }
  0x13   : > { %s926_s26 = scalar_select %p45_p7, %s834_s14, %s47_s21  }
  0x14   : > { %p928_p11 = por %p118_p10, %p60_p3  ;;  %p610_p13 = scmp.lt.s32.totalorder %s846_s17, 2 }
  0x15   : > { %s164_s28 = sand.u32 1, %s834_s14   ;;  %s587_s30 = sshll.u32 %s842_s16, 3 }
  0x16   : > { %s570_s29 = sshll.u32 %s164_s28, 3  ;;  %s175_s6 = scalar_lea.hbm %s1082_s0, %s587_s30 }
  0x17   : > { %s168_s7 = scalar_lea.vmem [#allocation2], %s570_s29  ;;  %s177_s9 = sshll.u32 %s175_s6, 4  ;;  %s178_s9 = int_to_ptr.hbm [resolvable:$true] %s177_s9 }
  0x18   : > { %s179_s8 = sshll.u32 %s168_s7, 4  ;;  %p941_p0 = pnand %p610_p13, %p911_p4  ;;  %s180_s8 = int_to_ptr.vmem [resolvable:$true] %s179_s8 }
  0x19   : > { %p575_p1 = scmp.ge.s32.totalorder %s846_s17, 1  ;;  %p205_p2 = scmp.lt.s32.totalorder %s846_s17, 3 }
  0x1a   : > { %s165_s11 = scalar_lea.sflag [#allocation3], %s164_s28  ;;  %s573_s18 = sshll.u32 %s164_s28, 1 }
  0x1b   : > { %599 = dma.hbm_to_vmem [thread:$0]  (!%p941_p0), %s178_s9, 128, %s180_s8, %s165_s11  }
  0x1c   : > { %p206_p3 = pnand %p575_p1, %p205_p2  ;;  %s574_s19 = sshll.u32 %s842_s16, 1 }
  0x1d   : > { %s196_s29 = scalar_lea.hbm %s1083_s1, %s574_s19  ;;  %s190_s30 = scalar_lea.vmem [#allocation5], %s573_s18 }
  0x1e   : > { %s200_s22 = sshll.u32 %s190_s30, 4  ;;  %s198_s4 = sshll.u32 %s196_s29, 4  ;;  %s201_s22 = int_to_ptr.vmem [resolvable:$true] %s200_s22  ;;  %s199_s4 = int_to_ptr.hbm [resolvable:$true] %s198_s4 }
  0x1f   : > { %s187_s5 = scalar_lea.sflag [#allocation6], %s164_s28  ;;  %209 = sbr.rel (%p206_p3) target bundleno = 120 (0x78), region = 28 }
  0x20   : > { %602 = dma.hbm_to_vmem [thread:$0]  (!%p941_p0), %s199_s4, 32, %s201_s22, %s187_s5  }
  0x21   : > { %s956_s6 = sand.u32 (!%p206_p3), 1, %s830_s13  }
  0x22   : > { %s576_s7 = sshll.u32 (!%p206_p3), %s956_s6, 3  ;;  %s212_s8 = scalar_lea.sflag (!%p206_p3), [#allocation3], %s956_s6 }
  0x23   : > { %s215_s9 = scalar_lea.vmem (!%p206_p3), [#allocation2], %s576_s7 }
  0x24   : > { %809 = dma.done.wait (%p917_p8), %s212_s8, 128  }
  0x25   : > { %811 = vsyncadd (%p917_p8), %s212_s8, 4294967168  ;;  %s965_s28 = sshll.u32 %s956_s6, 1  ;;  %s222_s10 = scalar_lea.sflag [#allocation6], %s956_s6 }
  0x26   : > { %s225_s11 = scalar_lea.vmem [#allocation5], %s965_s28 }
  0x27   : > { %813 = dma.done.wait (%p917_p8), %s222_s10, 32  }
  0x28   : > { %815 = vsyncadd (%p917_p8), %s222_s10, 4294967264  ;;  %v271_v0 = vld [vmem:[%s215_s9] sm:$0xff]  ;;  %vm279_vm0 = vcmask 1043456   ;;  %v265_v19 = vlaneseq  ;;  %s987_s24 = scalar_lea.vmem [#allocation7], %s965_s28  ;;  %v848_v23 = vmov 0.0   ;;  %s993_s18 = scalar_lea.vmem [#allocation8], %s965_s28 }
  0x29   : > { %274 = vst [vmem:[#allocation1] ss:$2 sm:$0xff] %v271_v0  ;;  %s583_s19 = sshll.u32 %s838_s15, 1  ;;  %vm368_vm2 = vcmask 1040384   ;;  %v272_v25 = vld [vmem:[%s225_s11] sm:$0x3] }
  0x2a   : > { %vm982_vm1 = vcmp.lt.s32.totalorder %v265_v19, 256  ;;  %v849_v26 = vmov 1   ;;  %vm362_vm3 = vcmp.ne.s32.totalorder %v272_v25, 255  ;;  %s422_s29 = scalar_lea.hbm %s1085_s3, %s583_s19  ;;  %s424_s30 = sshll.u32 %s993_s18, 4  ;;  %v329_v37 = vshrl.u32 %v265_v19, 7  ;;  %s425_s30 = int_to_ptr.vmem [resolvable:$true] %s424_s30 }
  0x2b   : > { %269 = vst.msk [vmem:[%s987_s24] sm:$0x3] %vm982_vm1, %v848_v23  ;;  %v367_v27 = vrot.slane %v849_v26, 7  ;;  %s426_s22 = sshll.u32 %s422_s29, 4  ;;  %v330_v40 = vperm.slane %v272_v25, 0  ;;  %v331_v41 = vperm.slane %v272_v25, 1  ;;  %s427_s22 = int_to_ptr.hbm [resolvable:$true] %s426_s22 }
  0x2c   : > { %270 = vst.msk [vmem:[%s993_s18] sm:$0x3] %vm982_vm1, %v848_v23  ;;  %s398_s4 = scalar_lea.sflag [#allocation9], %s956_s6  ;;  %s742_s5 = sshra.s32 %s427_s22, 4  ;;  %s743_s5 = int_to_ptr.hbm [resolvable:$true] %s742_s5 }
  0x2d   : > { %v369_v28 = vsel %vm368_vm2, 1, %v367_v27  ;;  %s744_s7 = scalar_lea.hbm %s743_s5, 2  ;;  %s748_s28 = scalar_lea.hbm %s1085_s3, 4 }
  0x2e   : > { %vm370_vm4 = vcmp.ne.s32.totalorder %v369_v28, 0  ;;  %p745_p4 = scmp.ne.s32.totalorder %s743_s5, %s744_s7  ;;  %p749_p7 = scmp.lt.s32.totalorder %s743_s5, %s1085_s3 }
  0x2f   : > { %vm1007_vm5 = vmand %vm362_vm3, %vm370_vm4  ;;  %p750_p8 = scmp.lt.s32.totalorder %s748_s28, %s744_s7 }
  0x30   : > { %v275_v1 = vld.sshfl [vmem:[#allocation1] sm:$0xff pattern:$0x75316420]  ;;  %v276_v2 = vld.sshfl [vmem:[#allocation1 + $0x8] sm:$0xff pattern:$0x75316420]  ;;  %p746_p5 = pnand %p745_p4, %p921_p9 }
  0x31   : > { %v280_v3 = vsel %vm279_vm0, %v275_v1, -inf  ;;  %v287_v4 = vsel %vm279_vm0, %v276_v2, -inf  ;;  %v580_v30 = vsel %vm1007_vm5, 1.0, %v848_v23  ;;  %p751_p10 = por %p750_p8, %p749_p7 }
  0x32   : > { %v281_v5 = vrot.slane %v280_v3, 4  ;;  %v288_v6 = vrot.slane %v287_v4, 4  ;;  %p747_p6 = pneg %p746_p5 }
  0x33   : > { %v387_v31 = vld [vmem:[%s993_s18] sm:$0x3] }
  0x34   : > { %v282_v7 = vmax.f32 %v280_v3, %v281_v5  ;;  %v289_v8 = vmax.f32 %v287_v4, %v288_v6  ;;  %v390_v34 = vadd.f32 %v580_v30, %v387_v31  ;;  %p752_p13 = pnand %p751_p10, %p747_p6 }
  0x36   : > { %v283_v9 = vrot.slane %v282_v7, 2  ;;  %v290_v10 = vrot.slane %v289_v8, 2  ;;  %391 = vst.msk [vmem:[%s993_s18] sm:$0x3] %vm982_vm1, %v390_v34 }
  0x38   : > { %v284_v11 = vmax.f32 %v282_v7, %v283_v9  ;;  %v291_v12 = vmax.f32 %v289_v8, %v290_v10 }
  0x3a   : > { %v285_v13 = vrot.slane %v284_v11, 1  ;;  %v292_v14 = vrot.slane %v291_v12, 1 }
  0x3c   : > { %v975_v15 = vmax.f32 %v291_v12, %v292_v14  ;;  %v977_v16 = vmax.f32 %v284_v11, %v285_v13 }
  0x3e   : > { %v296_v17 = vrot.slane %v975_v15, 4 }
  0x40   : > { %v297_v18 = vsel %vm279_vm0, %v977_v16, %v296_v17 }
  0x41   : > { %v299_v20 = vsub.f32 %v271_v0, %v297_v18 }
  0x43   : > { %v300_v22 = vmul.f32 1.442695, %v299_v20 }
  0x45   : > { %662 = vpow2.f32 %v300_v22 }
  0x4b   : > { %v663_v24 = vpop.eup %662 }
  0x4c   : > { %303 = vst [vmem:[#allocation1] ss:$2 sm:$0xff] %v663_v24 }
  0x53   : > { %v304_v32 = vld.sshfl [vmem:[#allocation1] sm:$0xff pattern:$0x75316420]  ;;  %v305_v33 = vld.sshfl [vmem:[#allocation1 + $0x8] sm:$0xff pattern:$0x75316420] }
  0x54   : > { %v308_v35 = vsel %vm279_vm0, %v304_v32, 0.0  ;;  %v315_v36 = vsel %vm279_vm0, %v305_v33, 0.0  ;;  %334 = vst [vmem:[#allocation1] ss:$2 sm:$0xff] %v271_v0 }
  0x55   : > { %v309_v38 = vrot.slane %v308_v35, 4  ;;  %v316_v39 = vrot.slane %v315_v36, 4 }
  0x56   : > { %755 = shalt.err (!%p752_p13)
}
  0x57   : > { %593 = dma.vmem_to_hbm [thread:$0]  (%p921_p9), %s425_s30, 32, %s427_s22, %s398_s4   ;;  %v310_v42 = vadd.f32 %v309_v38, %v308_v35  ;;  %v317_v43 = vadd.f32 %v316_v39, %v315_v36  ;;  %vm332_vm6 = vcmp.eq.s32.totalorder %v329_v37, %v330_v40  ;;  %vm333_vm7 = vcmp.eq.s32.totalorder %v329_v37, %v331_v41  ;;  %v372_v17 = vld [vmem:[%s987_s24] sm:$0x3] }
  0x58   : > { %s408_s23 = scalar_lea.hbm %s1084_s2, %s583_s19  ;;  %s410_s29 = sshll.u32 %s987_s24, 4  ;;  %s411_s29 = int_to_ptr.vmem [resolvable:$true] %s410_s29 }
  0x59   : > { %v311_v44 = vrot.slane %v310_v42, 2  ;;  %v318_v45 = vrot.slane %v317_v43, 2  ;;  %s412_s30 = sshll.u32 %s408_s23, 4  ;;  %s393_s15 = scalar_lea.sflag [#allocation4], %s956_s6  ;;  %s413_s30 = int_to_ptr.hbm [resolvable:$true] %s412_s30 }
  0x5a   : > { %s770_s22 = sshra.s32 %s413_s30, 4  ;;  %s776_s7 = scalar_lea.hbm %s1084_s2, 4  ;;  %s771_s22 = int_to_ptr.hbm [resolvable:$true] %s770_s22 }
  0x5b   : > { %v312_v46 = vadd.f32 %v311_v44, %v310_v42  ;;  %v319_v47 = vadd.f32 %v318_v45, %v317_v43  ;;  %v335_v48 = vld.sshfl [vmem:[#allocation1] sm:$0xff pattern:$0x75316420]  ;;  %v336_v49 = vld.sshfl [vmem:[#allocation1 + $0x8] sm:$0xff pattern:$0x75316420]  ;;  %p777_p3 = scmp.lt.s32.totalorder %s771_s22, %s1084_s2 }
  0x5c   : > { %v339_v50 = vsel %vm332_vm6, %v335_v48, 0.0  ;;  %v340_v51 = vsel %vm333_vm7, %v336_v49, 0.0  ;;  %s772_s19 = scalar_lea.hbm %s771_s22, 2 }
  0x5d   : > { %v313_v52 = vrot.slane %v312_v46, 1  ;;  %v320_v53 = vrot.slane %v319_v47, 1  ;;  %v341_v54 = vsel %vm279_vm0, %v339_v50, 0.0  ;;  %v348_v55 = vsel %vm279_vm0, %v340_v51, 0.0  ;;  %p773_p0 = scmp.ne.s32.totalorder %s771_s22, %s772_s19  ;;  %p778_p4 = scmp.lt.s32.totalorder %s776_s7, %s772_s19 }
  0x5e   : > { %v342_v56 = vrot.slane %v341_v54, 4  ;;  %v349_v57 = vrot.slane %v348_v55, 4 }
  0x5f   : > { %v314_v58 = vadd.f32 %v313_v52, %v312_v46  ;;  %v321_v59 = vadd.f32 %v320_v53, %v319_v47  ;;  %p774_p1 = pnand %p773_p0, %p921_p9  ;;  %p779_p5 = por %p778_p4, %p777_p3 }
  0x60   : > { %v343_v60 = vadd.f32 %v342_v56, %v341_v54  ;;  %v350_v61 = vadd.f32 %v349_v57, %v348_v55 }
  0x61   : > { %664 = vlog2.f32 %v314_v58  ;;  %p775_p2 = pneg %p774_p1 }
  0x62   : > { %666 = vlog2.f32 %v321_v59  ;;  %v344_v62 = vrot.slane %v343_v60, 2  ;;  %v351_v63 = vrot.slane %v350_v61, 2 }
  0x63   : > { %p780_p6 = pnand %p779_p5, %p775_p2 }
  0x64   : > { %v352_v0 = vadd.f32 %v351_v63, %v350_v61  ;;  %v345_v1 = vadd.f32 %v344_v62, %v343_v60 }
  0x66   : > { %v353_v3 = vrot.slane %v352_v0, 1  ;;  %v346_v7 = vrot.slane %v345_v1, 1 }
  0x67   : > { %v665_v2 = vpop.eup %664 }
  0x68   : > { %v667_v4 = vpop.eup %666  ;;  %v323_v5 = vmul.f32 0.6931472, %v665_v2  ;;  %v354_v10 = vadd.f32 %v353_v3, %v352_v0  ;;  %v347_v11 = vadd.f32 %v346_v7, %v345_v1 }
  0x69   : > { %v325_v6 = vmul.f32 0.6931472, %v667_v4 }
  0x6a   : > { %v326_v8 = vadd.f32 %v323_v5, %v977_v16 }
  0x6b   : > { %v327_v9 = vadd.f32 %v325_v6, %v975_v15 }
  0x6c   : > { %v373_v13 = vsub.f32 %v326_v8, %v347_v11 }
  0x6d   : > { %v374_v12 = vsub.f32 %v327_v9, %v354_v10 }
  0x6f   : > { %v377_v14 = vrot.slane %v374_v12, 7 }
  0x71   : > { %v378_v16 = vsel %vm368_vm2, %v373_v13, %v377_v14 }
  0x72   : > { %v380_v15 = vsel %vm1007_vm5, %v378_v16, 0.0 }
  0x73   : > { %v381_v18 = vadd.f32 %v380_v15, %v372_v17 }
  0x75   : > { %386 = vst.msk [vmem:[%s987_s24] sm:$0x3] %vm982_vm1, %v381_v18 }
  0x76   : > { %783 = shalt.err (!%p780_p6)
}
  0x77   : > { %592 = dma.vmem_to_hbm [thread:$0]  (%p921_p9), %s411_s29, 32, %s413_s30, %s393_s15  }
  0x78 PF: > { %s438_s6 = sand.u32 1, %s826_s12   ;;  %p604_p7 = pnand %p569_p12, %p928_p11 }
  0x79   : > { %s439_s24 = scalar_lea.sflag [#allocation4], %s438_s6 }
  0x7a   : > { %p605_p8 = pneg %p604_p7 }
  0x7c   : > { %817 = dma.done.wait (%p605_p8), %s439_s24, 32  }
  0x7d   : > { %819 = vsyncadd (%p605_p8), %s439_s24, 4294967264  ;;  %s449_s28 = scalar_lea.sflag [#allocation9], %s438_s6 }
  0x7e   : > { %821 = dma.done.wait (%p605_p8), %s449_s28, 32  }
  0x7f   : > { %823 = vsyncadd (%p605_p8), %s449_s28, 4294967264  ;;  %s26_s17 = sadd.s32 1, %s846_s17   ;;  %s1095_s12 = smov %s830_s13 }
  0x80   : > { %p23_p10 = scmp.ge.s32.totalorder %s26_s17, 4   ;;  %s1096_s13 = smov %s834_s14 }
  0x81   : > { %s1097_s14 = smov %s926_s26  ;;  %s1098_s15 = smov %s842_s16 }
  0x82   : > { %s1099_s16 = smov %s1101_s20  ;;  %25 = sbr.rel (!%p23_p10) target bundleno = 10 (0xa), region = 107 }
  0x87   :  { %455 = vsyncpa [#allocation3], 1 }
  0x88   :  { %457 = vsyncpa [#allocation3 + $0x1], 1 }
  0x89   :  { %458 = vsyncpa [#allocation6], 1 }
  0x8a   :  { %460 = vsyncpa [#allocation6 + $0x1], 1 }
  0x8b   :  { %461 = vsyncpa [#allocation4], 1 }
  0x8c   :  { %463 = vsyncpa [#allocation4 + $0x1], 1 }
  0x8d   :  { %464 = vsyncpa [#allocation9], 1 }
  0x8e   :  { %466 = vsyncpa [#allocation9 + $0x1], 1 }

</bundles_post_ra>
